<compile_context>
chip_gen: v5e
topology: v5e:2x2
jax: 0.10.0
libtpu: 0.0.40
codegen_flags: <defaults>
</compile_context>

<pallas_src>
import jax
import jax.numpy as jnp
from jax.experimental import pallas as pl
from jax.experimental.pallas import tpu as pltpu

LN_EPS = 1e-5         # nn.LayerNorm default
LEAKY_SLOPE = 0.01    # nn.LeakyReLU default


def _spec(shape):
    n = len(shape)
    return pl.BlockSpec(shape, lambda *_: (0,) * n)


# ----------------------------------------------------------------------------
# Single fused kernel:
#   encoder:  Linear(C->H) -> LayerNorm(H) -> LeakyReLU -> (+pos_enc) -> Linear(H->H)
#   VQ:       nearest-codebook indices, one-hot @ embeddings, commitment loss
#   decoder:  (+pos_dec[last]) -> Linear(H->C)  -- last frame per batch only
#   losses:   MSE(dec, y) and MSE(relu(dec), y)
# ----------------------------------------------------------------------------
def _fused_kernel(x_ref, w1_ref, b1_ref, g_ref, beta_ref, pos_enc_ref,
                  w2_ref, b2_ref, emb_ref, pos_dec_ref, wd_ref, bd_ref, y_ref,
                  dec_ref, idx_ref, scal_ref):
    N, _ = x_ref.shape
    T, _ = pos_enc_ref.shape
    K = emb_ref.shape[0]
    B = N // T

    # ---------------- encoder ----------------
    x = x_ref[...]                                                    # (N, C)
    h = jnp.dot(x, w1_ref[...], preferred_element_type=jnp.float32) + b1_ref[...]
    mu = jnp.mean(h, axis=-1, keepdims=True)
    var = jnp.mean((h - mu) ** 2, axis=-1, keepdims=True)
    h = (h - mu) * jax.lax.rsqrt(var + LN_EPS) * g_ref[...] + beta_ref[...]
    h = jnp.where(h >= 0, h, LEAKY_SLOPE * h)                         # LeakyReLU
    pos = pos_enc_ref[...]                                            # (T, H)
    pos_full = jnp.concatenate([pos] * B, axis=0) if B > 1 else pos   # (N, H)
    h = h + pos_full
    v = jnp.dot(h, w2_ref[...], preferred_element_type=jnp.float32) + b2_ref[...]

    # ---------------- vector quantization ----------------
    e = emb_ref[...]                                                  # (K, H)
    sim = jnp.dot(v, e.T, preferred_element_type=jnp.float32)         # (N, K)
    dist = (jnp.sum(v * v, axis=1, keepdims=True)
            + jnp.sum(e * e, axis=1)[None, :]
            - 2.0 * sim)                                              # (N, K)
    col = jax.lax.broadcasted_iota(jnp.int32, dist.shape, 1)
    dmin = jnp.min(dist, axis=1, keepdims=True)
    # first-occurrence argmin (matches torch.argmin tie behavior)
    idx = jnp.min(jnp.where(dist <= dmin, col, K), axis=1)            # (N,)
    onehot = (col == idx[:, None]).astype(jnp.float32)                # (N, K)
    q = jnp.dot(onehot, e, preferred_element_type=jnp.float32)        # (N, H)
    idx_ref[...] = idx.reshape(1, N).astype(jnp.int32)                # lane-dense row

    commit = jnp.mean((q - v) ** 2, keepdims=True)                    # (1, 1)

    # straight-through estimator: forward value of v + (q - v).detach()
    st = v + (q - v)                                                  # (N, H)

    # ---------------- decode only the last frame per batch ----------------
    # selection matrix sel[b, n] = 1 iff n == b*T + (T-1)
    rN = jax.lax.broadcasted_iota(jnp.int32, (B, N), 1)
    rB = jax.lax.broadcasted_iota(jnp.int32, (B, N), 0)
    sel = (rN == rB * T + (T - 1)).astype(jnp.float32)                # (B, N)
    q_last = jnp.dot(sel, st, preferred_element_type=jnp.float32)     # (B, H)
    hd = q_last + pos_dec_ref[...]                                    # + pos_dec[T-1]
    dec = jnp.dot(hd, wd_ref[...], preferred_element_type=jnp.float32) + bd_ref[...]
    dec_ref[...] = dec                                                # (B, C)

    # ---------------- losses ----------------
    y = y_ref[...]                                                    # (B, C)
    mse = jnp.mean((dec - y) ** 2, keepdims=True)                     # train_metrics (MSE)
    decoded = jnp.maximum(dec, 0.0)                                   # decoded[<0] = 0
    l2 = jnp.mean((decoded - y) ** 2, keepdims=True)
    scal_ref[...] = jnp.concatenate([commit, mse, l2], axis=1)        # (1, 3)


# ----------------------------------------------------------------------------
# Parameters
# ----------------------------------------------------------------------------
def init_params(key, C, T, H, K):
    ks = jax.random.split(key, 6)
    return dict(
        enc_w1=jax.random.normal(ks[0], (C, H), jnp.float32) * 0.02,
        enc_b1=jnp.zeros((1, H), jnp.float32),
        ln_g=jnp.ones((1, H), jnp.float32),
        ln_b=jnp.zeros((1, H), jnp.float32),
        pos_enc=jax.random.normal(ks[1], (T, H), jnp.float32) * 0.02,
        enc_w2=jax.random.normal(ks[2], (H, H), jnp.float32) * 0.02,
        enc_b2=jnp.zeros((1, H), jnp.float32),
        pos_dec=jax.random.normal(ks[3], (T, H), jnp.float32) * 0.02,
        dec_w=jax.random.normal(ks[4], (H, C), jnp.float32) * 0.02,
        dec_b=jnp.zeros((1, C), jnp.float32),
        embeddings=jax.random.normal(ks[5], (K, H), jnp.float32) * 0.02,
    )


# ----------------------------------------------------------------------------
# Wrapper (single fused pallas_call)
# ----------------------------------------------------------------------------
@jax.jit
def spectrogram_forward(inputs, params):
    """inputs: (B, C, T) float32, matching the PyTorch NCT convention."""
    B, C, T = inputs.shape
    K, H = params["embeddings"].shape
    N = B * T

    x2d = jnp.transpose(inputs, (0, 2, 1)).reshape(N, C)   # (B*T, C), time-minor rows
    y = inputs[:, :, T - 1]                                 # (B, C) last frame target
    pos_dec_last = params["pos_dec"][T - 1:T]               # (1, H) -- only row used

    dec, idx_row, scalars = pl.pallas_call(
        _fused_kernel,
        out_shape=(jax.ShapeDtypeStruct((B, C), jnp.float32),
                   jax.ShapeDtypeStruct((1, N), jnp.int32),
                   jax.ShapeDtypeStruct((1, 3), jnp.float32)),
        grid=(1,),
        in_specs=[_spec((N, C)), _spec((C, H)), _spec((1, H)), _spec((1, H)),
                  _spec((1, H)), _spec((T, H)), _spec((H, H)), _spec((1, H)),
                  _spec((K, H)), _spec((1, H)), _spec((H, C)), _spec((1, C)),
                  _spec((B, C))],
        out_specs=(_spec((B, C)), _spec((1, N)), _spec((1, 3))),
        compiler_params=pltpu.CompilerParams(dimension_semantics=("arbitrary",)),
    )(x2d, params["enc_w1"], params["enc_b1"], params["ln_g"], params["ln_b"],
      params["pos_enc"], params["enc_w2"], params["enc_b2"],
      params["embeddings"], pos_dec_last, params["dec_w"], params["dec_b"], y)

    commitment_loss = scalars[0, 0]
    codebook_loss = commitment_loss       # identical forward value (detach only)
    dec_mse = scalars[0, 1]               # train_metrics(dec, y) -> feeds opt_loss
    l2_loss = scalars[0, 2]               # clamped-MSE, overwrites reported dec_loss

    out = {
        "scalars": {
            "dec_loss": l2_loss,          # overwritten by clamped-MSE, as in PyTorch
            "commitment_loss": commitment_loss,
            "codebook_loss": codebook_loss,
            "opt_loss": dec_mse + 0.02 * commitment_loss + codebook_loss,
        },
        "imgs": {},
        "dec": dec,
        "encoding_indices": idx_row[0],
    }
    return out


if __name__ == "__main__":
    # config: num_embeddings=32, input_channels=16, hidden_channels=32,
    #         num_blocks=0, context_length=7 (-> T=8 frames), batch=2
    B, C, T, H, K = 2, 16, 8, 32, 32
    key = jax.random.PRNGKey(0)
    k_in, k_par = jax.random.split(key)
    inputs = jax.random.normal(k_in, (B, C, T), jnp.float32)   # NCT, like PyTorch
    params = init_params(k_par, C, T, H, K)

    out = spectrogram_forward(inputs, params)
    jax.block_until_ready(out["scalars"]["opt_loss"])
    print("KERNEL_OK")
</pallas_src>

<mosaic_0001>
module attributes {stable_mosaic.version = 11 : i64} {
  func.func @_fused_kernel(%arg0: i32, %arg1: memref<16x16xf32, #tpu.memory_space<vmem>>, %arg2: memref<16x32xf32, #tpu.memory_space<vmem>>, %arg3: memref<1x32xf32, #tpu.memory_space<vmem>>, %arg4: memref<1x32xf32, #tpu.memory_space<vmem>>, %arg5: memref<1x32xf32, #tpu.memory_space<vmem>>, %arg6: memref<8x32xf32, #tpu.memory_space<vmem>>, %arg7: memref<32x32xf32, #tpu.memory_space<vmem>>, %arg8: memref<1x32xf32, #tpu.memory_space<vmem>>, %arg9: memref<32x32xf32, #tpu.memory_space<vmem>>, %arg10: memref<1x32xf32, #tpu.memory_space<vmem>>, %arg11: memref<32x16xf32, #tpu.memory_space<vmem>>, %arg12: memref<1x16xf32, #tpu.memory_space<vmem>>, %arg13: memref<2x16xf32, #tpu.memory_space<vmem>>, %arg14: memref<2x16xf32, #tpu.memory_space<vmem>>, %arg15: memref<1x16xi32, #tpu.memory_space<vmem>>, %arg16: memref<1x3xf32, #tpu.memory_space<vmem>>) attributes {dimension_semantics = [#tpu.dimension_semantics<arbitrary>], iteration_bounds = array<i64: 1>, scalar_prefetch = 0 : i64, scratch_operands = 0 : i64, tpu.core_type = #tpu.core_type<tc>, window_params = [{pipeline_mode = #tpu.pipeline_mode<synchronous>, transform_indices = @transform_0, window_bounds = array<i64: 16, 16>}, {pipeline_mode = #tpu.pipeline_mode<synchronous>, transform_indices = @transform_1, window_bounds = array<i64: 16, 32>}, {pipeline_mode = #tpu.pipeline_mode<synchronous>, transform_indices = @transform_2, window_bounds = array<i64: 1, 32>}, {pipeline_mode = #tpu.pipeline_mode<synchronous>, transform_indices = @transform_3, window_bounds = array<i64: 1, 32>}, {pipeline_mode = #tpu.pipeline_mode<synchronous>, transform_indices = @transform_4, window_bounds = array<i64: 1, 32>}, {pipeline_mode = #tpu.pipeline_mode<synchronous>, transform_indices = @transform_5, window_bounds = array<i64: 8, 32>}, {pipeline_mode = #tpu.pipeline_mode<synchronous>, transform_indices = @transform_6, window_bounds = array<i64: 32, 32>}, {pipeline_mode = #tpu.pipeline_mode<synchronous>, transform_indices = @transform_7, window_bounds = array<i64: 1, 32>}, {pipeline_mode = #tpu.pipeline_mode<synchronous>, transform_indices = @transform_8, window_bounds = array<i64: 32, 32>}, {pipeline_mode = #tpu.pipeline_mode<synchronous>, transform_indices = @transform_9, window_bounds = array<i64: 1, 32>}, {pipeline_mode = #tpu.pipeline_mode<synchronous>, transform_indices = @transform_10, window_bounds = array<i64: 32, 16>}, {pipeline_mode = #tpu.pipeline_mode<synchronous>, transform_indices = @transform_11, window_bounds = array<i64: 1, 16>}, {pipeline_mode = #tpu.pipeline_mode<synchronous>, transform_indices = @transform_12, window_bounds = array<i64: 2, 16>}, {pipeline_mode = #tpu.pipeline_mode<synchronous>, transform_indices = @transform_13, window_bounds = array<i64: 2, 16>}, {pipeline_mode = #tpu.pipeline_mode<synchronous>, transform_indices = @transform_14, window_bounds = array<i64: 1, 16>}, {pipeline_mode = #tpu.pipeline_mode<synchronous>, transform_indices = @transform_15, window_bounds = array<i64: 1, 3>}]} {
    %c0 = arith.constant 0 : index
    %c0_0 = arith.constant 0 : index
    %0 = vector.load %arg1[%c0, %c0_0] : memref<16x16xf32, #tpu.memory_space<vmem>>, vector<16x16xf32>
    %c0_1 = arith.constant 0 : index
    %c0_2 = arith.constant 0 : index
    %1 = vector.load %arg2[%c0_1, %c0_2] : memref<16x32xf32, #tpu.memory_space<vmem>>, vector<16x32xf32>
    %cst = arith.constant dense<0.000000e+00> : vector<16x32xf32>
    %2 = tpu.matmul %0, %1, %cst {dimension_numbers = #tpu.dot_dimension_numbers<[1], [0], [0], [1], [0, 0, 1, 1], [], []>} : vector<16x16xf32>, vector<16x32xf32>, vector<16x32xf32> -> vector<16x32xf32>
    %c0_3 = arith.constant 0 : index
    %c0_4 = arith.constant 0 : index
    %3 = vector.load %arg3[%c0_3, %c0_4] : memref<1x32xf32, #tpu.memory_space<vmem>>, vector<1x32xf32>
    %4 = vector.broadcast %3 : vector<1x32xf32> to vector<16x32xf32>
    %5 = arith.addf %2, %4 : vector<16x32xf32>
    %cst_5 = arith.constant dense<0.000000e+00> : vector<16xf32>
    %6 = vector.multi_reduction <add>, %5, %cst_5 [1] : vector<16x32xf32> to vector<16xf32>
    %7 = vector.shape_cast %6 : vector<16xf32> to vector<16x1xf32>
    %cst_6 = arith.constant 3.200000e+01 : f32
    %8 = vector.broadcast %cst_6 : f32 to vector<16x1xf32>
    %9 = arith.divf %7, %8 : vector<16x1xf32>
    %10 = vector.broadcast %9 : vector<16x1xf32> to vector<16x32xf32>
    %11 = arith.subf %5, %10 : vector<16x32xf32>
    %12 = arith.mulf %11, %11 : vector<16x32xf32>
    %cst_7 = arith.constant dense<0.000000e+00> : vector<16xf32>
    %13 = vector.multi_reduction <add>, %12, %cst_7 [1] : vector<16x32xf32> to vector<16xf32>
    %14 = vector.shape_cast %13 : vector<16xf32> to vector<16x1xf32>
    %cst_8 = arith.constant 3.200000e+01 : f32
    %15 = vector.broadcast %cst_8 : f32 to vector<16x1xf32>
    %16 = arith.divf %14, %15 : vector<16x1xf32>
    %17 = vector.broadcast %9 : vector<16x1xf32> to vector<16x32xf32>
    %18 = arith.subf %5, %17 : vector<16x32xf32>
    %cst_9 = arith.constant 9.99999974E-6 : f32
    %19 = vector.broadcast %cst_9 : f32 to vector<16x1xf32>
    %20 = arith.addf %16, %19 : vector<16x1xf32>
    %21 = math.rsqrt %20 : vector<16x1xf32>
    %22 = vector.broadcast %21 : vector<16x1xf32> to vector<16x32xf32>
    %23 = arith.mulf %18, %22 : vector<16x32xf32>
    %c0_10 = arith.constant 0 : index
    %c0_11 = arith.constant 0 : index
    %24 = vector.load %arg4[%c0_10, %c0_11] : memref<1x32xf32, #tpu.memory_space<vmem>>, vector<1x32xf32>
    %25 = vector.broadcast %24 : vector<1x32xf32> to vector<16x32xf32>
    %26 = arith.mulf %23, %25 : vector<16x32xf32>
    %c0_12 = arith.constant 0 : index
    %c0_13 = arith.constant 0 : index
    %27 = vector.load %arg5[%c0_12, %c0_13] : memref<1x32xf32, #tpu.memory_space<vmem>>, vector<1x32xf32>
    %28 = vector.broadcast %27 : vector<1x32xf32> to vector<16x32xf32>
    %29 = arith.addf %26, %28 : vector<16x32xf32>
    %cst_14 = arith.constant 0.000000e+00 : f32
    %30 = vector.broadcast %cst_14 : f32 to vector<16x32xf32>
    %31 = arith.cmpf oge, %29, %30 : vector<16x32xf32>
    %cst_15 = arith.constant 0.00999999977 : f32
    %32 = vector.broadcast %cst_15 : f32 to vector<16x32xf32>
    %33 = arith.mulf %32, %29 : vector<16x32xf32>
    %34 = arith.select %31, %29, %33 : vector<16x32xi1>, vector<16x32xf32>
    %c0_16 = arith.constant 0 : index
    %c0_17 = arith.constant 0 : index
    %35 = vector.load %arg6[%c0_16, %c0_17] : memref<8x32xf32, #tpu.memory_space<vmem>>, vector<8x32xf32>
    %36 = tpu.concatenate %35, %35 in 0 : vector<8x32xf32>, vector<8x32xf32> -> vector<16x32xf32>
    %37 = arith.addf %34, %36 : vector<16x32xf32>
    %c0_18 = arith.constant 0 : index
    %c0_19 = arith.constant 0 : index
    %38 = vector.load %arg7[%c0_18, %c0_19] : memref<32x32xf32, #tpu.memory_space<vmem>>, vector<32x32xf32>
    %cst_20 = arith.constant dense<0.000000e+00> : vector<16x32xf32>
    %39 = tpu.matmul %37, %38, %cst_20 {dimension_numbers = #tpu.dot_dimension_numbers<[1], [0], [0], [1], [0, 0, 1, 1], [], []>} : vector<16x32xf32>, vector<32x32xf32>, vector<16x32xf32> -> vector<16x32xf32>
    %c0_21 = arith.constant 0 : index
    %c0_22 = arith.constant 0 : index
    %40 = vector.load %arg8[%c0_21, %c0_22] : memref<1x32xf32, #tpu.memory_space<vmem>>, vector<1x32xf32>
    %41 = vector.broadcast %40 : vector<1x32xf32> to vector<16x32xf32>
    %42 = arith.addf %39, %41 : vector<16x32xf32>
    %c0_23 = arith.constant 0 : index
    %c0_24 = arith.constant 0 : index
    %43 = vector.load %arg9[%c0_23, %c0_24] : memref<32x32xf32, #tpu.memory_space<vmem>>, vector<32x32xf32>
    %44 = tpu.transpose %43, [1, 0] : vector<32x32xf32> -> vector<32x32xf32>
    %cst_25 = arith.constant dense<0.000000e+00> : vector<16x32xf32>
    %45 = tpu.matmul %42, %44, %cst_25 {dimension_numbers = #tpu.dot_dimension_numbers<[1], [0], [0], [1], [0, 0, 1, 1], [], []>} : vector<16x32xf32>, vector<32x32xf32>, vector<16x32xf32> -> vector<16x32xf32>
    %46 = arith.mulf %42, %42 : vector<16x32xf32>
    %cst_26 = arith.constant dense<0.000000e+00> : vector<16xf32>
    %47 = vector.multi_reduction <add>, %46, %cst_26 [1] : vector<16x32xf32> to vector<16xf32>
    %48 = vector.shape_cast %47 : vector<16xf32> to vector<16x1xf32>
    %49 = arith.mulf %43, %43 : vector<32x32xf32>
    %cst_27 = arith.constant dense<0.000000e+00> : vector<32xf32>
    %50 = vector.multi_reduction <add>, %49, %cst_27 [1] : vector<32x32xf32> to vector<32xf32>
    %51 = vector.shape_cast %50 : vector<32xf32> to vector<1x32xf32>
    %52 = vector.broadcast %48 : vector<16x1xf32> to vector<16x32xf32>
    %53 = vector.broadcast %51 : vector<1x32xf32> to vector<16x32xf32>
    %54 = arith.addf %52, %53 : vector<16x32xf32>
    %cst_28 = arith.constant 2.000000e+00 : f32
    %55 = vector.broadcast %cst_28 : f32 to vector<16x32xf32>
    %56 = arith.mulf %55, %45 : vector<16x32xf32>
    %57 = arith.subf %54, %56 : vector<16x32xf32>
    %58 = tpu.iota {dimensions = array<i32: 1>} : vector<16x32xi32>
    %cst_29 = arith.constant dense<0x7F800000> : vector<16xf32>
    %59 = vector.multi_reduction <minimumf>, %57, %cst_29 [1] : vector<16x32xf32> to vector<16xf32>
    %60 = vector.shape_cast %59 : vector<16xf32> to vector<16x1xf32>
    %61 = vector.broadcast %60 : vector<16x1xf32> to vector<16x32xf32>
    %62 = arith.cmpf ole, %57, %61 : vector<16x32xf32>
    %c32_i32 = arith.constant 32 : i32
    %63 = vector.broadcast %c32_i32 : i32 to vector<16x32xi32>
    %64 = arith.select %62, %58, %63 : vector<16x32xi1>, vector<16x32xi32>
    %cst_30 = arith.constant dense<2147483647> : vector<16xi32>
    %65 = vector.multi_reduction <minsi>, %64, %cst_30 [1] : vector<16x32xi32> to vector<16xi32>
    %66 = vector.shape_cast %65 : vector<16xi32> to vector<16x1xi32>
    %67 = vector.broadcast %66 : vector<16x1xi32> to vector<16x32xi32>
    %68 = arith.cmpi eq, %58, %67 : vector<16x32xi32>
    %69 = arith.extui %68 : vector<16x32xi1> to vector<16x32xi32>
    %70 = arith.sitofp %69 : vector<16x32xi32> to vector<16x32xf32>
    %cst_31 = arith.constant dense<0.000000e+00> : vector<16x32xf32>
    %71 = tpu.matmul %70, %43, %cst_31 {dimension_numbers = #tpu.dot_dimension_numbers<[1], [0], [0], [1], [0, 0, 1, 1], [], []>} : vector<16x32xf32>, vector<32x32xf32>, vector<16x32xf32> -> vector<16x32xf32>
    %72 = vector.shape_cast %65 : vector<16xi32> to vector<1x16xi32>
    %c0_32 = arith.constant 0 : index
    %c0_33 = arith.constant 0 : index
    %73 = vector.load %arg15[%c0_32, %c0_33] : memref<1x16xi32, #tpu.memory_space<vmem>>, vector<1x16xi32>
    tpu.vector_store %arg15[%c0_32, %c0_33], %72 {strides = array<i32>} : memref<1x16xi32, #tpu.memory_space<vmem>>, vector<1x16xi32>,
    %74 = arith.subf %71, %42 : vector<16x32xf32>
    %75 = arith.mulf %74, %74 : vector<16x32xf32>
    %76 = vector.shape_cast %75 : vector<16x32xf32> to vector<1x16x32xf32>
    %cst_34 = arith.constant dense<0.000000e+00> : vector<1xf32>
    %77 = vector.multi_reduction <add>, %76, %cst_34 [1, 2] : vector<1x16x32xf32> to vector<1xf32>
    %78 = vector.shape_cast %77 : vector<1xf32> to vector<1x1x1xf32>
    %79 = vector.extract %78[0, 0, 0] : f32 from vector<1x1x1xf32>
    %80 = vector.broadcast %79 : f32 to vector<1x1xf32>
    %cst_35 = arith.constant 5.120000e+02 : f32
    %81 = vector.broadcast %cst_35 : f32 to vector<1x1xf32>
    %82 = arith.divf %80, %81 : vector<1x1xf32>
    %83 = arith.subf %71, %42 : vector<16x32xf32>
    %84 = arith.addf %42, %83 : vector<16x32xf32>
    %85 = tpu.iota {dimensions = array<i32: 1>} : vector<2x16xi32>
    %86 = tpu.iota {dimensions = array<i32: 0>} : vector<2x16xi32>
    %c8_i32 = arith.constant 8 : i32
    %87 = vector.broadcast %c8_i32 : i32 to vector<2x16xi32>
    %88 = arith.muli %86, %87 : vector<2x16xi32>
    %c7_i32 = arith.constant 7 : i32
    %89 = vector.broadcast %c7_i32 : i32 to vector<2x16xi32>
    %90 = arith.addi %88, %89 : vector<2x16xi32>
    %91 = arith.cmpi eq, %85, %90 : vector<2x16xi32>
    %92 = arith.extui %91 : vector<2x16xi1> to vector<2x16xi32>
    %93 = arith.sitofp %92 : vector<2x16xi32> to vector<2x16xf32>
    %cst_36 = arith.constant dense<0.000000e+00> : vector<2x32xf32>
    %94 = tpu.matmul %93, %84, %cst_36 {dimension_numbers = #tpu.dot_dimension_numbers<[1], [0], [0], [1], [0, 0, 1, 1], [], []>} : vector<2x16xf32>, vector<16x32xf32>, vector<2x32xf32> -> vector<2x32xf32>
    %c0_37 = arith.constant 0 : index
    %c0_38 = arith.constant 0 : index
    %95 = vector.load %arg10[%c0_37, %c0_38] : memref<1x32xf32, #tpu.memory_space<vmem>>, vector<1x32xf32>
    %96 = vector.broadcast %95 : vector<1x32xf32> to vector<2x32xf32>
    %97 = arith.addf %94, %96 : vector<2x32xf32>
    %c0_39 = arith.constant 0 : index
    %c0_40 = arith.constant 0 : index
    %98 = vector.load %arg11[%c0_39, %c0_40] : memref<32x16xf32, #tpu.memory_space<vmem>>, vector<32x16xf32>
    %cst_41 = arith.constant dense<0.000000e+00> : vector<2x16xf32>
    %99 = tpu.matmul %97, %98, %cst_41 {dimension_numbers = #tpu.dot_dimension_numbers<[1], [0], [0], [1], [0, 0, 1, 1], [], []>} : vector<2x32xf32>, vector<32x16xf32>, vector<2x16xf32> -> vector<2x16xf32>
    %c0_42 = arith.constant 0 : index
    %c0_43 = arith.constant 0 : index
    %100 = vector.load %arg12[%c0_42, %c0_43] : memref<1x16xf32, #tpu.memory_space<vmem>>, vector<1x16xf32>
    %101 = vector.broadcast %100 : vector<1x16xf32> to vector<2x16xf32>
    %102 = arith.addf %99, %101 : vector<2x16xf32>
    %c0_44 = arith.constant 0 : index
    %c0_45 = arith.constant 0 : index
    %103 = vector.load %arg14[%c0_44, %c0_45] : memref<2x16xf32, #tpu.memory_space<vmem>>, vector<2x16xf32>
    tpu.vector_store %arg14[%c0_44, %c0_45], %102 {strides = array<i32>} : memref<2x16xf32, #tpu.memory_space<vmem>>, vector<2x16xf32>,
    %c0_46 = arith.constant 0 : index
    %c0_47 = arith.constant 0 : index
    %104 = vector.load %arg13[%c0_46, %c0_47] : memref<2x16xf32, #tpu.memory_space<vmem>>, vector<2x16xf32>
    %105 = arith.subf %102, %104 : vector<2x16xf32>
    %106 = arith.mulf %105, %105 : vector<2x16xf32>
    %107 = vector.shape_cast %106 : vector<2x16xf32> to vector<1x2x16xf32>
    %cst_48 = arith.constant dense<0.000000e+00> : vector<1xf32>
    %108 = vector.multi_reduction <add>, %107, %cst_48 [1, 2] : vector<1x2x16xf32> to vector<1xf32>
    %109 = vector.shape_cast %108 : vector<1xf32> to vector<1x1x1xf32>
    %110 = vector.extract %109[0, 0, 0] : f32 from vector<1x1x1xf32>
    %111 = vector.broadcast %110 : f32 to vector<1x1xf32>
    %cst_49 = arith.constant 3.200000e+01 : f32
    %112 = vector.broadcast %cst_49 : f32 to vector<1x1xf32>
    %113 = arith.divf %111, %112 : vector<1x1xf32>
    %cst_50 = arith.constant 0.000000e+00 : f32
    %114 = vector.broadcast %cst_50 : f32 to vector<2x16xf32>
    %115 = arith.maximumf %102, %114 : vector<2x16xf32>
    %116 = arith.subf %115, %104 : vector<2x16xf32>
    %117 = arith.mulf %116, %116 : vector<2x16xf32>
    %118 = vector.shape_cast %117 : vector<2x16xf32> to vector<1x2x16xf32>
    %cst_51 = arith.constant dense<0.000000e+00> : vector<1xf32>
    %119 = vector.multi_reduction <add>, %118, %cst_51 [1, 2] : vector<1x2x16xf32> to vector<1xf32>
    %120 = vector.shape_cast %119 : vector<1xf32> to vector<1x1x1xf32>
    %121 = vector.extract %120[0, 0, 0] : f32 from vector<1x1x1xf32>
    %122 = vector.broadcast %121 : f32 to vector<1x1xf32>
    %cst_52 = arith.constant 3.200000e+01 : f32
    %123 = vector.broadcast %cst_52 : f32 to vector<1x1xf32>
    %124 = arith.divf %122, %123 : vector<1x1xf32>
    %125 = tpu.concatenate %82, %113, %124 in 1 : vector<1x1xf32>, vector<1x1xf32>, vector<1x1xf32> -> vector<1x3xf32>
    %c0_53 = arith.constant 0 : index
    %c0_54 = arith.constant 0 : index
    %126 = vector.load %arg16[%c0_53, %c0_54] : memref<1x3xf32, #tpu.memory_space<vmem>>, vector<1x3xf32>
    tpu.vector_store %arg16[%c0_53, %c0_54], %125 {strides = array<i32>} : memref<1x3xf32, #tpu.memory_space<vmem>>, vector<1x3xf32>,
    return
  }
  func.func @transform_0(%arg0: i32) -> (i32, i32) {
    %c0_i32 = arith.constant 0 : i32
    %c0_i32_0 = arith.constant 0 : i32
    %c0_i32_1 = arith.constant 0 : i32
    return %c0_i32, %c0_i32_0 : i32, i32
  }
  func.func @transform_1(%arg0: i32) -> (i32, i32) {
    %c0_i32 = arith.constant 0 : i32
    %c0_i32_0 = arith.constant 0 : i32
    %c0_i32_1 = arith.constant 0 : i32
    return %c0_i32, %c0_i32_0 : i32, i32
  }
  func.func @transform_2(%arg0: i32) -> (i32, i32) {
    %c0_i32 = arith.constant 0 : i32
    %c0_i32_0 = arith.constant 0 : i32
    %c0_i32_1 = arith.constant 0 : i32
    return %c0_i32, %c0_i32_0 : i32, i32
  }
  func.func @transform_3(%arg0: i32) -> (i32, i32) {
    %c0_i32 = arith.constant 0 : i32
    %c0_i32_0 = arith.constant 0 : i32
    %c0_i32_1 = arith.constant 0 : i32
    return %c0_i32, %c0_i32_0 : i32, i32
  }
  func.func @transform_4(%arg0: i32) -> (i32, i32) {
    %c0_i32 = arith.constant 0 : i32
    %c0_i32_0 = arith.constant 0 : i32
    %c0_i32_1 = arith.constant 0 : i32
    return %c0_i32, %c0_i32_0 : i32, i32
  }
  func.func @transform_5(%arg0: i32) -> (i32, i32) {
    %c0_i32 = arith.constant 0 : i32
    %c0_i32_0 = arith.constant 0 : i32
    %c0_i32_1 = arith.constant 0 : i32
    return %c0_i32, %c0_i32_0 : i32, i32
  }
  func.func @transform_6(%arg0: i32) -> (i32, i32) {
    %c0_i32 = arith.constant 0 : i32
    %c0_i32_0 = arith.constant 0 : i32
    %c0_i32_1 = arith.constant 0 : i32
    return %c0_i32, %c0_i32_0 : i32, i32
  }
  func.func @transform_7(%arg0: i32) -> (i32, i32) {
    %c0_i32 = arith.constant 0 : i32
    %c0_i32_0 = arith.constant 0 : i32
    %c0_i32_1 = arith.constant 0 : i32
    return %c0_i32, %c0_i32_0 : i32, i32
  }
  func.func @transform_8(%arg0: i32) -> (i32, i32) {
    %c0_i32 = arith.constant 0 : i32
    %c0_i32_0 = arith.constant 0 : i32
    %c0_i32_1 = arith.constant 0 : i32
    return %c0_i32, %c0_i32_0 : i32, i32
  }
  func.func @transform_9(%arg0: i32) -> (i32, i32) {
    %c0_i32 = arith.constant 0 : i32
    %c0_i32_0 = arith.constant 0 : i32
    %c0_i32_1 = arith.constant 0 : i32
    return %c0_i32, %c0_i32_0 : i32, i32
  }
  func.func @transform_10(%arg0: i32) -> (i32, i32) {
    %c0_i32 = arith.constant 0 : i32
    %c0_i32_0 = arith.constant 0 : i32
    %c0_i32_1 = arith.constant 0 : i32
    return %c0_i32, %c0_i32_0 : i32, i32
  }
  func.func @transform_11(%arg0: i32) -> (i32, i32) {
    %c0_i32 = arith.constant 0 : i32
    %c0_i32_0 = arith.constant 0 : i32
    %c0_i32_1 = arith.constant 0 : i32
    return %c0_i32, %c0_i32_0 : i32, i32
  }
  func.func @transform_12(%arg0: i32) -> (i32, i32) {
    %c0_i32 = arith.constant 0 : i32
    %c0_i32_0 = arith.constant 0 : i32
    %c0_i32_1 = arith.constant 0 : i32
    return %c0_i32, %c0_i32_0 : i32, i32
  }
  func.func @transform_13(%arg0: i32) -> (i32, i32) {
    %c0_i32 = arith.constant 0 : i32
    %c0_i32_0 = arith.constant 0 : i32
    %c0_i32_1 = arith.constant 0 : i32
    return %c0_i32, %c0_i32_0 : i32, i32
  }
  func.func @transform_14(%arg0: i32) -> (i32, i32) {
    %c0_i32 = arith.constant 0 : i32
    %c0_i32_0 = arith.constant 0 : i32
    %c0_i32_1 = arith.constant 0 : i32
    return %c0_i32, %c0_i32_0 : i32, i32
  }
  func.func @transform_15(%arg0: i32) -> (i32, i32) {
    %c0_i32 = arith.constant 0 : i32
    %c0_i32_0 = arith.constant 0 : i32
    %c0_i32_1 = arith.constant 0 : i32
    return %c0_i32, %c0_i32_0 : i32, i32
  }
}

</mosaic_0001>

<bundles_post_ra>
// kernel: spectrogram_forward.1
= control target key start
LH: loop header
LB: loop body
LE: loop exit
PB: predicated region body
PF: predicated region fallthrough
CT: control target
= control target key end

     0   :  { %21 = vsyncpa [#allocation3], 0  ;;  %s969_s0 = inlined_call_operand.vmem [shape: f32[16,16], index: 0, kind: input, shape index: {}]   ;;  %s970_s1 = inlined_call_operand.hbm [shape: f32[16,32], index: 1, kind: input, shape index: {}]   ;;  %s971_s2 = inlined_call_operand.vmem [shape: f32[1,32], index: 2, kind: input, shape index: {}]   ;;  %s972_s3 = inlined_call_operand.vmem [shape: f32[1,32], index: 3, kind: input, shape index: {}]   ;;  %s973_s4 = inlined_call_operand.vmem [shape: f32[1,32], index: 4, kind: input, shape index: {}]   ;;  %s974_s5 = inlined_call_operand.vmem [shape: f32[8,32], index: 5, kind: input, shape index: {}]   ;;  %s975_s6 = inlined_call_operand.vmem [shape: f32[32,32], index: 6, kind: input, shape index: {}]   ;;  %s976_s7 = inlined_call_operand.vmem [shape: f32[1,32], index: 7, kind: input, shape index: {}]   ;;  %s977_s8 = inlined_call_operand.hbm [shape: f32[32,32], index: 8, kind: input, shape index: {}]   ;;  %s978_s9 = inlined_call_operand.vmem [shape: f32[1,32], index: 9, kind: input, shape index: {}]   ;;  %s979_s10 = inlined_call_operand.vmem [shape: f32[32,16], index: 10, kind: input, shape index: {}]   ;;  %s980_s11 = inlined_call_operand.vmem [shape: f32[1,16], index: 11, kind: input, shape index: {}]   ;;  %s981_s12 = inlined_call_operand.vmem [shape: f32[2,16], index: 12, kind: input, shape index: {}]   ;;  %s982_s13 = inlined_call_operand.hbm [shape: f32[2,16], index: 13, kind: output, shape index: {0}]   ;;  %s983_s14 = inlined_call_operand.hbm [shape: s32[1,16], index: 14, kind: output, shape index: {1}]   ;;  %s984_s15 = inlined_call_operand.vmem [shape: f32[1,3], index: 15, kind: output, shape index: {2}]  }
   0x1   :  { %22 = vsyncpa [#allocation6], 0 }
   0x2   :  { %23 = vsyncpa [#allocation4], 0 }
   0x3   :  { %24 = vsyncpa [#allocation9], 0  ;;  %s31_s20 = sshll.u32 %s970_s1, 4  ;;  %s734_s21 = smov [#allocation2]   ;;  %s32_s20 = int_to_ptr.hbm [resolvable:$true] %s31_s20 }
   0x4   :  { %s33_s22 = sshll.u32 %s734_s21, 4  ;;  %s56_s25 = sshll.u32 %s977_s8, 4  ;;  %s34_s22 = int_to_ptr.vmem [resolvable:$true] %s33_s22  ;;  %s57_s25 = int_to_ptr.hbm [resolvable:$true] %s56_s25 }
   0x5   :  { %s735_s26 = smov 128   ;;  %s736_s27 = smov 8  }
   0x6   :  { %39 = dma.hbm_to_vmem [thread:$0]  %s32_s20, 256, %s34_s22, [#allocation3], %s735_s26, %s735_s26, %s736_s27  }
   0x7   :  { %s737_s28 = smov [#allocation5]  }
   0x8   :  { %s58_s29 = sshll.u32 %s737_s28, 4  ;;  %s59_s29 = int_to_ptr.vmem [resolvable:$true] %s58_s29 }
   0x9   :  { %64 = dma.hbm_to_vmem [thread:$0]  %s57_s25, 512, %s59_s29, [#allocation6], %s735_s26, %s735_s26, %s736_s27  }
   0xa   :  { %726 = dma.done.wait [#allocation3], 256  }
   0xb   :  { %727 = vsyncadd [#allocation3], 4294967040 }
   0xc   :  { %728 = dma.done.wait [#allocation6], 512  }
   0xd   :  { %729 = vsyncadd [#allocation6], 4294966784  ;;  %v84_v0 = vld [vmem:[#allocation2 + $0x8] sm:$0xff]  ;;  %v83_v1 = vld [vmem:[#allocation2] sm:$0xff]  ;;  %vm89_vm0 = vcmask 130048   ;;  %vm119_vm1 = vcmask 261120  }
   0xe   :  { %110 = vmatpush.msra.mxu0 %v84_v0  ;;  %v81_v2 = vld [vmem:[%s969_s0] sm:$0xff]  ;;  %v82_v3 = vld [vmem:[%s969_s0 + $0x8] sm:$0xff]  ;;  %v738_v11 = vmov 32.0   ;;  %v195_v28 = vld [vmem:[%s975_s6 + $0x18] sm:$0xff]  ;;  %vm307_vm11 = vcmask 130112   ;;  %vm311_vm12 = vcmask 195712  }
   0xf   :  { %v616_v4 = vld [vmem:[%s971_s2] ss:$0 sm:$0xff]  ;;  %622 = vrcp.f32 %v738_v11  ;;  %218 = vmatpush.msra.mxu1 %v195_v28  ;;  %v194_v29 = vld [vmem:[%s975_s6 + $0x10] sm:$0xff]  ;;  %v193_v30 = vld [vmem:[%s975_s6 + $0x8] sm:$0xff]  ;;  %vm315_vm13 = vcmask 261312   ;;  %s553_s24 = sshll.u32 %s982_s13, 4  ;;  %s554_s24 = int_to_ptr.hbm [resolvable:$true] %s553_s24 }
  0x10   :  { %111 = vmatpush.msra.mxu0 %v83_v1  ;;  %v192_v31 = vld [vmem:[%s975_s6] sm:$0xff]  ;;  %v232_v37 = vld [vmem:[#allocation5 + $0x18] sm:$0xff]  ;;  %v229_v38 = vld [vmem:[#allocation5] sm:$0xff]  ;;  %s564_s27 = sshll.u32 %s983_s14, 4  ;;  %s565_s27 = int_to_ptr.hbm [resolvable:$true] %s564_s27 }
  0x11   :  { %584 = vmatmul.msk.f32.vlgmr.msra.gmra.mxu0 %vm89_vm0, %v81_v2  ;;  %219 = vmatpush.msra.mxu1 %v194_v29  ;;  %v282_v41 = vmul.f32 %v229_v38, %v229_v38  ;;  %v231_v43 = vld [vmem:[#allocation5 + $0x10] sm:$0xff]  ;;  %v230_v44 = vld [vmem:[#allocation5 + $0x8] sm:$0xff] }
  0x12   :  { %588 = vmatpush.xpose.msk.msra.mxu2 %vm119_vm1, %v232_v37  ;;  %400 = vmatpush.msra.mxu3 %v232_v37  ;;  %v283_v47 = vmul.f32 %v230_v44, %v230_v44  ;;  %v617_v54 = vld [vmem:[%s972_s3] ss:$0 sm:$0xff]  ;;  %v284_v11 = vmul.f32 %v231_v43, %v231_v43 }
  0x13   :  { %220 = vmatpush.msra.mxu1 %v193_v30  ;;  %v286_v45 = vsel %vm119_vm1, %v282_v41, 0.0  ;;  %v618_v58 = vld [vmem:[%s973_s4] ss:$0 sm:$0xff] }
  0x14   :  { %401 = vmatpush.msra.mxu3 %v231_v43  ;;  %287 = vadd.xlane.f32.xlu2 %v286_v45  ;;  %v289_v51 = vsel %vm119_vm1, %v283_v47, 0.0  ;;  %v189_v1 = vld [vmem:[%s974_s5] sm:$0xff] }
  0x15   :  { %v623_v12 = vpop.eup %622  ;;  %221 = vmatpush.msra.mxu1 %v192_v31 }
  0x16   :  { %v127_v13 = vmul.f32 32.0, %v623_v12  ;;  %vm131_vm2 = vweird.f32 %v623_v12  ;;  %589 = vmatpush.xpose.msk.msra.mxu2 %vm119_vm1, %v231_v43  ;;  %402 = vmatpush.msra.mxu3 %v230_v44 }
  0x18   :  { %v128_v14 = vsub.f32 1.0, %v127_v13  ;;  %403 = vmatpush.msra.mxu3 %v229_v38  ;;  %v292_v13 = vsel %vm119_vm1, %v284_v11, 0.0 }
  0x19   :  { %585 = vmatmul.msk.f32.gmra.mxu0 %vm89_vm0, %v82_v3 }
  0x1a   :  { %v129_v15 = vmul.f32 %v623_v12, %v128_v14  ;;  %590 = vmatpush.xpose.msk.msra.mxu2 %vm119_vm1, %v230_v44 }
  0x1c   :  { %v130_v16 = vadd.f32 %v623_v12, %v129_v15  ;;  %290 = vadd.xlane.f32.xlu2 %v289_v51  ;;  %v619_v15 = vld [vmem:[%s976_s7] ss:$0 sm:$0xff] }
  0x1e   :  { %v842_v17 = vsel %vm131_vm2, %v623_v12, %v130_v16  ;;  %591 = vmatpush.xpose.msk.msra.mxu2 %vm119_vm1, %v229_v38  ;;  %v285_v12 = vmul.f32 %v232_v37, %v232_v37 }
  0x20   :  { %v295_v14 = vsel %vm119_vm1, %v285_v12, 0.0 }
  0x8e   :  { %v113_v5 = vpop.f32.mrf.mxu0 }
  0x8f   :  { %v114_v6 = vadd.f32 %v616_v4, %v113_v5 }
  0x91   :  { %v120_v7 = vsel %vm119_vm1, %v114_v6, 0.0 }
  0x92   :  { %121 = vadd.xlane.f32.xlu0 %v120_v7 }
  0x96   :  { %v116_v8 = vpop.f32.mrf.mxu0 }
  0x97   :  { %v117_v9 = vadd.f32 %v616_v4, %v116_v8 }
  0x99   :  { %v123_v10 = vsel %vm119_vm1, %v117_v9, 0.0 }
  0x9a   :  { %124 = vadd.xlane.f32.xlu0 %v123_v10 }
  0xa2   :  { %293 = vadd.xlane.f32.xlu0 %v292_v13  ;;  %v739_v13 = vmov 0.0  }
 0x105   :  { %v122_v18 = vpop.xlane.xlu0 %121 }
 0x106   :  { %v133_v19 = vmul.f32 %v842_v17, %v122_v18 }
 0x108   :  { %v135_v20 = vsub.f32 %v114_v6, %v133_v19 }
 0x10a   :  { %v137_v21 = vmul.f32 %v135_v20, %v135_v20 }
 0x10c   :  { %v139_v22 = vsel %vm119_vm1, %v137_v21, 0.0 }
 0x10d   :  { %140 = vadd.xlane.f32.xlu1 %v139_v22  ;;  %v125_v23 = vpop.xlane.xlu0 %124 }
 0x10e   :  { %v134_v24 = vmul.f32 %v842_v17, %v125_v23 }
 0x110   :  { %v847_v25 = vsub.f32 %v117_v9, %v134_v24 }
 0x112   :  { %v138_v26 = vmul.f32 %v847_v25, %v847_v25 }
 0x114   :  { %v142_v27 = vsel %vm119_vm1, %v138_v26, 0.0  ;;  %v288_v26 = vpop.xlane.xlu2 %287 }
 0x115   :  { %143 = vadd.xlane.f32.xlu1 %v142_v27 }
 0x11c   :  { %v291_v29 = vpop.xlane.xlu2 %290 }
 0x11d   :  { %296 = vadd.xlane.f32.xlu1 %v295_v14 }
 0x180   :  { %v141_v32 = vpop.xlane.xlu1 %140 }
 0x181   :  { %v145_v33 = vmul.f32 %v141_v32, %v842_v17 }
 0x183   :  { %v147_v34 = vadd.f32 1e-05, %v145_v33  ;;  %v294_v33 = vpop.xlane.xlu0 %293 }
 0x185   :  { %624 = vrsqrt.f32 %v147_v34  ;;  %vm155_vm4 = vweird.f32 %v147_v34 }
 0x188   :  { %v144_v35 = vpop.xlane.xlu1 %143 }
 0x189   :  { %v146_v36 = vmul.f32 %v144_v35, %v842_v17 }
 0x18b   :  { %v625_v39 = vpop.eup %624  ;;  %v148_v40 = vadd.f32 1e-05, %v146_v36 }
 0x18c   :  { %v150_v42 = vmul.f32 %v625_v39, %v147_v34  ;;  %vm156_vm3 = vweird.f32 %v625_v39 }
 0x18d   :  { %626 = vrsqrt.f32 %v148_v40  ;;  %vm157_vm5 = vmor %vm155_vm4, %vm156_vm3  ;;  %vm165_vm7 = vweird.f32 %v148_v40 }
 0x18e   :  { %v151_v46 = vmul.f32 %v625_v39, %v150_v42 }
 0x190   :  { %v152_v48 = vmul.f32 0.5, %v151_v46  ;;  %v297_v36 = vpop.xlane.xlu1 %296 }
 0x192   :  { %v153_v49 = vsub.f32 1.5, %v152_v48 }
 0x193   :  { %v627_v50 = vpop.eup %626 }
 0x194   :  { %v154_v52 = vmul.f32 %v625_v39, %v153_v49  ;;  %v160_v53 = vmul.f32 %v627_v50, %v148_v40  ;;  %vm166_vm6 = vweird.f32 %v627_v50 }
 0x195   :  { %vm167_vm8 = vmor %vm165_vm7, %vm166_vm6  ;;  %vm414_vm6 = vcmask 122880  }
 0x196   :  { %v158_v55 = vsel %vm157_vm5, %v625_v39, %v154_v52  ;;  %v161_v56 = vmul.f32 %v627_v50, %v160_v53 }
 0x197   :  { %v169_v57 = vmul.f32 %v158_v55, %v135_v20 }
 0x198   :  { %v162_v59 = vmul.f32 0.5, %v161_v56 }
 0x199   :  { %v175_v60 = vmul.f32 %v617_v54, %v169_v57 }
 0x19a   :  { %v163_v61 = vsub.f32 1.5, %v162_v59 }
 0x19b   :  { %v181_v62 = vadd.f32 %v618_v58, %v175_v60 }
 0x19c   :  { %v164_v63 = vmul.f32 %v627_v50, %v163_v61 }
 0x19d   :  { %vm183_vm9 = vcmp.ge.f32.partialorder %v181_v62, 0.0  ;;  %v185_v0 = vmul.f32 0.01, %v181_v62 }
 0x19e   :  { %v168_v2 = vsel %vm167_vm8, %v627_v50, %v164_v63  ;;  %vm540_vm8 = vcmask 7168  }
 0x19f   :  { %v170_v3 = vmul.f32 %v168_v2, %v847_v25  ;;  %v187_v4 = vsel %vm183_vm9, %v181_v62, %v185_v0  ;;  %v302_v25 = vlaneseq  ;;  %vm542_vm9 = vcmask 15360  }
 0x1a0   :  { %v190_v5 = vadd.f32 %v189_v1, %v187_v4 }
 0x1a1   :  { %v176_v6 = vmul.f32 %v617_v54, %v170_v3  ;;  %v904_v27 = vand.u32 127, %v302_v25 }
 0x1a2   :  { %586 = vmatmul.msk.f32.vlgmr.msra.gmra.mxu1 %vm119_vm1, %v190_v5 }
 0x1a3   :  { %v182_v7 = vadd.f32 %v618_v58, %v176_v6  ;;  %v907_v28 = vadd.s32 4294967288, %v904_v27  ;;  %v309_v30 = vadd.s32 4294967280, %v904_v27  ;;  %v304_v31 = vperm.slane %v288_v26, %v904_v27 }
 0x1a4   :  { %v313_v34 = vadd.s32 4294967272, %v904_v27 }
 0x1a5   :  { %vm184_vm10 = vcmp.ge.f32.partialorder %v182_v7, 0.0  ;;  %v186_v8 = vmul.f32 0.01, %v182_v7  ;;  %v306_v32 = vperm.slane %v291_v29, %v907_v28  ;;  %v310_v35 = vperm.slane %v294_v33, %v309_v30 }
 0x1a6   :  { %v314_v38 = vperm.slane %v297_v36, %v313_v34  ;;  %v444_v29 = vshrl.u32 %v302_v25, 7 }
 0x1a7   :  { %v188_v9 = vsel %vm184_vm10, %v182_v7, %v186_v8  ;;  %v308_v37 = vsel %vm307_vm11, %v306_v32, %v304_v31  ;;  %vm544_vm10 = vcmask 16384  }
 0x1a8   :  { %v191_v10 = vadd.f32 %v189_v1, %v188_v9  ;;  %v312_v39 = vsel %vm311_vm12, %v310_v35, %v308_v37  ;;  %v445_v31 = vmul.u32 8, %v444_v29 }
 0x1a9   :  { %v316_v41 = vsel %vm315_vm13, %v314_v38, %v312_v39 }
 0x1aa   :  { %587 = vmatmul.msk.f32.gmra.mxu1 %vm119_vm1, %v191_v10  ;;  %v446_v33 = vadd.s32 7, %v445_v31 }
 0x1ac   :  { %vm447_vm7 = vcmp.eq.s32.totalorder %v904_v27, %v446_v33 }
 0x1ad   :  { %v598_v39 = vsel %vm447_vm7, 1.0, %v739_v13 }
 0x21f   :  { %v223_v16 = vpop.f32.mrf.mxu1 }
 0x220   :  { %v889_v18 = vadd.f32 %v619_v15, %v223_v16 }
 0x222   :  { %592 = vmatmul.msk.f32.vlgmr.msra.gmra.mxu2 %vm119_vm1, %v889_v18  ;;  %v274_v19 = vmul.f32 %v889_v18, %v889_v18 }
 0x224   :  { %v276_v20 = vsel %vm119_vm1, %v274_v19, 0.0 }
 0x225   :  { %277 = vadd.xlane.f32.xlu2 %v276_v20 }
 0x227   :  { %v226_v21 = vpop.f32.mrf.mxu1 }
 0x228   :  { %v896_v22 = vadd.f32 %v619_v15, %v226_v21 }
 0x22a   :  { %593 = vmatmul.msk.f32.gmra.mxu2 %vm119_vm1, %v896_v22  ;;  %v275_v23 = vmul.f32 %v896_v22, %v896_v22 }
 0x22c   :  { %v279_v24 = vsel %vm119_vm1, %v275_v23, 0.0 }
 0x22d   :  { %280 = vadd.xlane.f32.xlu0 %v279_v24 }
 0x298   :  { %v278_v40 = vpop.xlane.xlu2 %277 }
 0x299   :  { %v330_v43 = vadd.f32 %v316_v41, %v278_v40 }
 0x2a0   :  { %v281_v47 = vpop.xlane.xlu0 %280 }
 0x2a1   :  { %v331_v49 = vadd.f32 %v316_v41, %v281_v47  ;;  %v620_v47 = vld [vmem:[%s978_s9] ss:$0 sm:$0xff]  ;;  %s740_s9 = smov [#allocation7]  }
 0x2a2   :  { %s551_s22 = sshll.u32 %s740_s9, 4  ;;  %s552_s22 = int_to_ptr.vmem [resolvable:$true] %s551_s22 }
 0x2a5   :  { %v268_v42 = vpop.f32.mrf.mxu2 }
 0x2a6   :  { %v332_v44 = vmul.f32 2.0, %v268_v42  ;;  %v477_v42 = vld [vmem:[%s979_s10] sm:$0xff] }
 0x2a8   :  { %v334_v45 = vsub.f32 %v330_v43, %v332_v44 }
 0x2aa   :  { %v336_v46 = vsel %vm119_vm1, %v334_v45, inf }
 0x2ab   :  { %337 = vmin.xlane.f32.xlu1 %v336_v46 }
 0x2ad   :  { %v271_v48 = vpop.f32.mrf.mxu2 }
 0x2ae   :  { %v333_v50 = vmul.f32 2.0, %v271_v48 }
 0x2b0   :  { %v335_v51 = vsub.f32 %v331_v49, %v333_v50 }
 0x2b2   :  { %v339_v52 = vsel %vm119_vm1, %v335_v51, inf }
 0x2b3   :  { %340 = vmin.xlane.f32.xlu2 %v339_v52 }
 0x31e   :  { %v338_v53 = vpop.xlane.xlu1 %337 }
 0x31f   :  { %vm342_vm14 = vcmp.le.f32.partialorder %v334_v45, %v338_v53  ;;  %v621_v53 = vld [vmem:[%s980_s11] ss:$0 sm:$0xff] }
 0x320   :  { %v344_v54 = vsel %vm342_vm14, %v904_v27, 32 }
 0x321   :  { %v346_v55 = vsel %vm119_vm1, %v344_v54, 2147483647 }
 0x322   :  { %v348_v56 = vshra.s32 %v346_v55, 16  ;;  %v347_v63 = vand.u32 65535, %v346_v55  ;;  %v510_v55 = vld [vmem:[%s981_s12] sm:$0x3]  ;;  %s741_s12 = smov [#allocation8]  }
 0x323   :  { %s562_s6 = sshll.u32 %s741_s12, 4  ;;  %s563_s6 = int_to_ptr.vmem [resolvable:$true] %s562_s6 }
 0x324   :  { %v350_v57 = vcvt.s32.f32 %v348_v56  ;;  %v349_v1 = vcvt.s32.f32 %v347_v63 }
 0x326   :  { %351 = vmin.xlane.f32.xlu0 %v350_v57  ;;  %v341_v58 = vpop.xlane.xlu2 %340 }
 0x327   :  { %vm343_vm15 = vcmp.le.f32.partialorder %v335_v51, %v341_v58 }
 0x328   :  { %v345_v59 = vsel %vm343_vm15, %v904_v27, 32 }
 0x329   :  { %v361_v60 = vsel %vm119_vm1, %v345_v59, 2147483647 }
 0x32a   :  { %v363_v61 = vshra.s32 %v361_v60, 16  ;;  %v362_v3 = vand.u32 65535, %v361_v60 }
 0x32c   :  { %v365_v62 = vcvt.s32.f32 %v363_v61  ;;  %v364_v5 = vcvt.s32.f32 %v362_v3 }
 0x32e   :  { %366 = vmin.xlane.f32.xlu1 %v365_v62 }
 0x399   :  { %v352_v0 = vpop.xlane.xlu0 %351 }
 0x39a   :  { %vm353_vm2 = vcmp.eq.f32.partialorder %v350_v57, %v352_v0  ;;  %v358_v7 = vcvt.f32.s32 %v352_v0 }
 0x39b   :  { %v354_v2 = vsel %vm353_vm2, %v349_v1, inf }
 0x39c   :  { %355 = vmin.xlane.f32.xlu2 %v354_v2  ;;  %v359_v9 = vshll.u32 %v358_v7, 16 }
 0x3a1   :  { %v367_v4 = vpop.xlane.xlu1 %366 }
 0x3a2   :  { %vm368_vm3 = vcmp.eq.f32.partialorder %v365_v62, %v367_v4  ;;  %v373_v12 = vcvt.f32.s32 %v367_v4 }
 0x3a3   :  { %v369_v6 = vsel %vm368_vm3, %v364_v5, inf }
 0x3a4   :  { %370 = vmin.xlane.f32.xlu0 %v369_v6  ;;  %v374_v16 = vshll.u32 %v373_v12, 16 }
 0x40f   :  { %v356_v8 = vpop.xlane.xlu2 %355 }
 0x410   :  { %v357_v10 = vcvt.f32.s32 %v356_v8 }
 0x412   :  { %v360_v11 = vadd.s32 %v359_v9, %v357_v10 }
 0x414   :  { %vm376_vm4 = vcmp.eq.s32.totalorder %v904_v27, %v360_v11  ;;  %v411_v21 = vperm.slane %v360_v11, %v904_v27 }
 0x415   :  { %v594_v14 = vsel %vm376_vm4, 1.0, %v739_v13 }
 0x416   :  { %596 = vmatmul.msk.f32.vlgmr.msra.gmra.mxu3 %vm119_vm1, %v594_v14  ;;  %v742_v14 = vmov 512.0  }
 0x417   :  { %v371_v15 = vpop.xlane.xlu0 %370  ;;  %628 = vrcp.f32 %v742_v14 }
 0x418   :  { %v372_v19 = vcvt.f32.s32 %v371_v15 }
 0x41a   :  { %v375_v20 = vadd.s32 %v374_v16, %v372_v19 }
 0x41c   :  { %v412_v23 = vperm.slane %v375_v20, %v907_v28  ;;  %vm377_vm5 = vcmp.eq.s32.totalorder %v904_v27, %v375_v20  ;;  %v480_v27 = vld [vmem:[%s979_s10 + $0x18] sm:$0xff] }
 0x41d   :  { %v595_v24 = vsel %vm377_vm5, 1.0, %v739_v13  ;;  %500 = vmatpush.msrb.mxu1 %v480_v27  ;;  %v629_v15 = vpop.eup %628 }
 0x41e   :  { %597 = vmatmul.msk.f32.gmra.mxu3 %vm119_vm1, %v595_v24  ;;  %v413_v26 = vsel %vm307_vm11, %v412_v23, %v411_v21  ;;  %v434_v16 = vmul.f32 512.0, %v629_v15 }
 0x41f   :  { %415 = vst.msk [vmem:[#allocation8] sm:$0x1] %vm414_vm6, %v413_v26 }
 0x420   :  { %567 = dma.vmem_to_hbm [thread:$0]  %s563_s6, 16, %s565_s27, [#allocation9]   ;;  %v435_v19 = vsub.f32 1.0, %v434_v16 }
 0x422   :  { %v436_v20 = vmul.f32 %v629_v15, %v435_v19 }
 0x424   :  { %v437_v21 = vadd.f32 %v629_v15, %v436_v20 }
 0x499   :  { %v405_v30 = vpop.f32.mrf.mxu3 }
 0x49a   :  { %v416_v32 = vsub.f32 %v405_v30, %v889_v18 }
 0x49c   :  { %v418_v35 = vmul.f32 %v416_v32, %v416_v32  ;;  %v441_v38 = vadd.f32 %v416_v32, %v889_v18  ;;  %v478_v18 = vld [vmem:[%s979_s10 + $0x8] sm:$0xff] }
 0x49e   :  { %v420_v25 = vsel %vm119_vm1, %v418_v35, 0.0 }
 0x4a1   :  { %v408_v34 = vpop.f32.mrf.mxu3 }
 0x4a2   :  { %v417_v28 = vsub.f32 %v408_v34, %v896_v22 }
 0x4a4   :  { %v419_v36 = vmul.f32 %v417_v28, %v417_v28  ;;  %v442_v37 = vadd.f32 %v417_v28, %v896_v22  ;;  %v479_v22 = vld [vmem:[%s979_s10 + $0x10] sm:$0xff] }
 0x4a5   :  { %501 = vmatpush.msrb.mxu1 %v479_v22 }
 0x4a6   :  { %471 = vmatpush.msrb.mxu0 %v442_v37  ;;  %v421_v40 = vsel %vm119_vm1, %v419_v36, 0.0 }
 0x4a7   :  { %v422_v41 = vadd.f32 %v421_v40, %v420_v25  ;;  %502 = vmatpush.msrb.mxu1 %v478_v18 }
 0x4a8   :  { %472 = vmatpush.msrb.mxu0 %v441_v38 }
 0x4a9   :  { %599 = vmatmul.msk.f32.vlgmr.msrb.gmra.mxu0 %vm89_vm0, %v598_v39  ;;  %423 = vadd.xlane.f32.xlu1 %v422_v41  ;;  %vm508_vm0 = vcmask 123904  }
 0x4aa   :  { %503 = vmatpush.msrb.mxu1 %v477_v42 }
 0x51c   :  { %v424_v43 = vpop.xlane.xlu1 %423 }
 0x51d   :  { %v425_v44 = vrot.slane %v424_v43, 4 }
 0x51f   :  { %v426_v45 = vadd.f32 %v425_v44, %v424_v43 }
 0x521   :  { %v427_v46 = vrot.slane %v426_v45, 2 }
 0x523   :  { %v428_v48 = vadd.f32 %v427_v46, %v426_v45 }
 0x525   :  { %v429_v49 = vrot.slane %v428_v48, 1 }
 0x526   :  { %v474_v50 = vpop.f32.mrf.mxu0 }
 0x527   :  { %v475_v51 = vadd.f32 %v620_v47, %v474_v50  ;;  %v430_v52 = vadd.f32 %v429_v49, %v428_v48 }
 0x529   :  { %601 = vpush %v430_v52  ;;  %600 = vmatmul.msk.f32.vlgmr.msrb.gmra.mxu1 %vm119_vm1, %v475_v51  ;;  %vm438_vm1 = vweird.f32 %v629_v15 }
 0x52a   :  { %v439_v24 = vsel %vm438_vm1, %v629_v15, %v437_v21 }
 0x55a   :  { %s602_s13 = spop %601 }
 0x55b   :  { %v432_v23 = vstv %s602_s13 }
 0x55c   :  { %v440_v29 = vmul.f32 %v439_v24, %v432_v23 }
 0x5a6   :  { %v505_v54 = vpop.f32.mrf.mxu1 }
 0x5a7   :  { %v506_v56 = vadd.f32 %v621_v53, %v505_v54 }
 0x5a9   :  { %v511_v57 = vsub.f32 %v506_v56, %v510_v55  ;;  %509 = vst.msk [vmem:[#allocation7] sm:$0x3] %vm508_vm0, %v506_v56  ;;  %v525_v58 = vmax.f32 %v506_v56, 0.0 }
 0x5aa   :  { %556 = dma.vmem_to_hbm [thread:$0]  %s552_s22, 32, %s554_s24, [#allocation4]  }
 0x5ab   :  { %v512_v59 = vmul.f32 %v511_v57, %v511_v57  ;;  %v526_v60 = vsub.f32 %v525_v58, %v510_v55 }
 0x5ad   :  { %v513_v61 = vsel %vm508_vm0, %v512_v59, 0.0  ;;  %v527_v62 = vmul.f32 %v526_v60, %v526_v60 }
 0x5ae   :  { %514 = vadd.xlane.f32.xlu2 %v513_v61 }
 0x5af   :  { %v528_v63 = vsel %vm508_vm0, %v527_v62, 0.0 }
 0x5b0   :  { %529 = vadd.xlane.f32.xlu0 %v528_v63 }
 0x621   :  { %v515_v0 = vpop.xlane.xlu2 %514 }
 0x622   :  { %v516_v1 = vrot.slane %v515_v0, 4 }
 0x623   :  { %v530_v2 = vpop.xlane.xlu0 %529 }
 0x624   :  { %v517_v3 = vadd.f32 %v516_v1, %v515_v0  ;;  %v531_v4 = vrot.slane %v530_v2, 4 }
 0x626   :  { %v518_v5 = vrot.slane %v517_v3, 2  ;;  %v532_v6 = vadd.f32 %v531_v4, %v530_v2 }
 0x628   :  { %v519_v7 = vadd.f32 %v518_v5, %v517_v3  ;;  %v533_v8 = vrot.slane %v532_v6, 2 }
 0x62a   :  { %v534_v9 = vadd.f32 %v533_v8, %v532_v6  ;;  %v520_v10 = vrot.slane %v519_v7, 1 }
 0x62c   :  { %v521_v11 = vadd.f32 %v520_v10, %v519_v7  ;;  %v535_v12 = vrot.slane %v534_v9, 1 }
 0x62e   :  { %603 = vpush %v521_v11  ;;  %v536_v13 = vadd.f32 %v535_v12, %v534_v9 }
 0x630   :  { %605 = vpush %v536_v13 }
 0x65f   :  { %s604_s14 = spop %603 }
 0x660   :  { %v523_v26 = vstv %s604_s14 }
 0x661   :  { %v524_v30 = vmul.f32 %v523_v26, %v842_v17  ;;  %s606_s3 = spop %605 }
 0x662   :  { %v538_v31 = vstv %s606_s3 }
 0x663   :  { %v541_v32 = vsel %vm540_vm8, %v440_v29, %v524_v30  ;;  %v539_v33 = vmul.f32 %v538_v31, %v842_v17 }
 0x665   :  { %v543_v34 = vsel %vm542_vm9, %v541_v32, %v539_v33 }
 0x666   :  { %545 = vst.msk [vmem:[%s984_s15] sm:$0x1] %vm544_vm10, %v543_v34 }
 0x667   :  { %730 = dma.done.wait [#allocation4], 32  }
 0x668   :  { %731 = vsyncadd [#allocation4], 4294967264 }
 0x669   :  { %732 = dma.done.wait [#allocation9], 16  }
 0x66a   :  { %733 = vsyncadd [#allocation9], 4294967280 }
 0x66b   :  { %580 = vsyncpa [#allocation3], 1 }
 0x66c   :  { %581 = vsyncpa [#allocation6], 1 }
 0x66d   :  { %582 = vsyncpa [#allocation4], 1 }
 0x66e   :  { %583 = vsyncpa [#allocation9], 1 }

</bundles_post_ra>
